<compile_context>
chip_gen: v7x
topology: tpu7x:2x2x1
jax: 0.10.0
libtpu: 0.0.40
codegen_flags: <defaults>
</compile_context>

<pallas_src>
import functools

import jax
import jax.numpy as jnp
from jax import lax
from jax.experimental import pallas as pl
from jax.experimental.pallas import tpu as pltpu
import numpy as np


def lstm_forward_kernel(ids_ref, table_ref, whh_ref, wout_ref, bout_ref,
                        out_ref, *, seq_len, batch):
    """Full LSTM recurrence + pooling + classifier on one core.

    ids_ref  : (T*B, 1) int32  token ids (batch already padded to 8 sublanes)
    table_ref: (V, 4H)         precomputed embed @ W_ih^T + bias,
                               g-gate columns pre-scaled by 2
    whh_ref  : (H, 4H)         hidden->gates weight (transposed W_hh),
                               g-gate columns pre-scaled by 2
    wout_ref : (H, C)          classifier weight (transposed)
    bout_ref : (1, C)          classifier bias
    out_ref  : (B, C)          logits (padded batch rows are garbage, sliced off)
    """
    T, B = seq_len, batch
    V = table_ref.shape[0]
    H = whh_ref.shape[0]
    G = 4 * H
    TB = T * B

    # ---- fused embedding gather + input projection + bias, as ONE MXU matmul
    #      against the precomputed (V, 4H) table (V is small -> MXU gather). ----
    ids = ids_ref[...]                                                # (T*B, 1)
    onehot = (ids == lax.broadcasted_iota(jnp.int32, (TB, V), 1)
              ).astype(jnp.float32)                                   # (T*B, V)
    xw = jnp.dot(onehot, table_ref[...],
                 preferred_element_type=jnp.float32)                  # (T*B, 4H)
    xw = xw.reshape(T, B, G)

    whh = whh_ref[...]

    h = jnp.zeros((B, H), jnp.float32)
    c = jnp.zeros((B, H), jnp.float32)
    m = None   # running max of raw h_t (t=0 peeled)

    # Fully-unrolled recurrence (static Python loop == full unroll; T is small).
    # Only the hidden-state matmul remains on the serial critical path.
    for t in range(T):
        gates = xw[t] + jnp.dot(h, whh,
                                preferred_element_type=jnp.float32)   # (B, 4H)
        # Single full-width sigmoid on the (B, 128) gates tile (the only
        # full-width EUP op per step).  PyTorch gate order is [i, f, g, o];
        # g-gate pre-activations were pre-scaled by 2 at weight prep, so
        # tanh(g_pre) == 2*sigmoid(2*g_pre) - 1 == 2*sig[:, 2H:3H] - 1.
        sig = jax.nn.sigmoid(gates)
        i_g = sig[:, 0 * H:1 * H]
        f_g = sig[:, 1 * H:2 * H]
        g_g = 2.0 * sig[:, 2 * H:3 * H] - 1.0
        o_g = sig[:, 3 * H:4 * H]
        c = f_g * c + i_g * g_g
        h = o_g * jnp.tanh(c)
        # tanh is monotone: max_t tanh(h_t) == tanh(max_t h_t) -> track raw max.
        m = h if m is None else jnp.maximum(m, h)

    pooled = jnp.tanh(jnp.tanh(m))   # tanh(max_pool(tanh(lstm_out)))
    out_ref[...] = (jnp.dot(pooled, wout_ref[...],
                            preferred_element_type=jnp.float32)
                    + bout_ref[...])
    # NOTE: (B, C)=(8, 5) output is a one-off masked store; pad C to 128 lanes
    # only if this grows (per review, negligible at this shape).


def prepare_kernel_params(params):
    """One-time weight prep (fold embed projection + bias; pre-scale g-gate)."""
    w_ih = params["w_ih"]          # (4H, D)  PyTorch layout
    w_hh = params["w_hh"]          # (4H, H)
    H = w_hh.shape[1]
    bias = params["b_ih"] + params["b_hh"]                          # (4H,)
    table = params["embed"] @ w_ih.T + bias[None, :]                # (V, 4H)
    whh_t = w_hh.T                                                  # (H, 4H)
    # Pre-scale g-gate columns by 2 so tanh(x) = 2*sigmoid(2x) - 1 needs no tanh.
    scale = jnp.ones((4 * H,), jnp.float32).at[2 * H:3 * H].set(2.0)
    table = table * scale[None, :]
    whh_t = whh_t * scale[None, :]
    return {
        "table": table,                                             # (V, 4H)
        "whh_t": whh_t,                                             # (H, 4H)
        "wout_t": params["w_out"].T,                                # (H, C)
        "bout": params["b_out"].reshape(1, -1),                     # (1, C)
    }


@jax.jit
def lstm_model_forward(token_ids, kparams):
    """token_ids: (T, B) int32.  kparams: output of prepare_kernel_params.
    Returns logits (B, C)."""
    T, B = token_ids.shape
    C = kparams["wout_t"].shape[1]

    # Pad batch to a full 8-sublane tile so every (B, H)/(B, 4H) tensor in the
    # recurrence occupies whole vreg sublanes; padded rows (token id 0) are
    # computed independently and sliced off below, so they cannot leak into the
    # real rows' max-pool or classifier output.
    # TODO(synk): for throughput, batch more sequences per call (B of 32-128).
    B_pad = max(8, ((B + 7) // 8) * 8)
    ids = jnp.pad(token_ids.astype(jnp.int32), ((0, 0), (0, B_pad - B)))
    ids2d = ids.reshape(T * B_pad, 1)

    vmem = pl.BlockSpec(memory_space=pltpu.MemorySpace.VMEM)
    kernel = functools.partial(lstm_forward_kernel, seq_len=T, batch=B_pad)

    logits_padded = pl.pallas_call(
        kernel,
        out_shape=jax.ShapeDtypeStruct((B_pad, C), jnp.float32),
        in_specs=[vmem] * 5,
        out_specs=vmem,
    )(ids2d, kparams["table"], kparams["whh_t"],
      kparams["wout_t"], kparams["bout"])

    return logits_padded[:B]


def make_params(key, V, D, H, C):
    """Deterministic synthetic parameters matching nn.LSTM / nn.Linear shapes."""
    ks = jax.random.split(key, 7)
    k = 1.0 / np.sqrt(H)
    embed = jax.random.normal(ks[0], (V, D), jnp.float32) * 0.1
    w_ih = jax.random.uniform(ks[1], (4 * H, D), jnp.float32, -k, k)   # PyTorch (4H, D)
    w_hh = jax.random.uniform(ks[2], (4 * H, H), jnp.float32, -k, k)   # PyTorch (4H, H)
    b_ih = jax.random.uniform(ks[3], (4 * H,), jnp.float32, -k, k)
    b_hh = jax.random.uniform(ks[4], (4 * H,), jnp.float32, -k, k)
    kc = 1.0 / np.sqrt(H)
    w_out = jax.random.uniform(ks[5], (C, H), jnp.float32, -kc, kc)    # PyTorch (C, H)
    b_out = jax.random.uniform(ks[6], (C,), jnp.float32, -kc, kc)
    return {"embed": embed, "w_ih": w_ih, "w_hh": w_hh,
            "b_ih": b_ih, "b_hh": b_hh, "w_out": w_out, "b_out": b_out}


def reference_forward(token_ids, params):
    """Pure-JAX reference mirroring the PyTorch forward (eval mode)."""
    x = jnp.take(params["embed"], token_ids, axis=0)  # (T, B, D)
    T, B, D = x.shape
    H = params["w_hh"].shape[1]
    wih_t = params["w_ih"].T                          # (D, 4H)
    whh_t = params["w_hh"].T                          # (H, 4H)
    bias = (params["b_ih"] + params["b_hh"])[None, :]

    def step(carry, x_t):
        h, c = carry
        gates = x_t @ wih_t + h @ whh_t + bias
        i_g = jax.nn.sigmoid(gates[:, 0 * H:1 * H])
        f_g = jax.nn.sigmoid(gates[:, 1 * H:2 * H])
        g_g = jnp.tanh(gates[:, 2 * H:3 * H])
        o_g = jax.nn.sigmoid(gates[:, 3 * H:4 * H])
        c = f_g * c + i_g * g_g
        h = o_g * jnp.tanh(c)
        return (h, c), h

    (_, _), hs = lax.scan(step, (jnp.zeros((B, H)), jnp.zeros((B, H))), x)
    # (T, B, H) -> transpose(0,1) -> (B, T, H) -> transpose(1,2) -> (B, H, T)
    lstm_out = jnp.transpose(hs, (1, 2, 0))
    lstm_out = jnp.tanh(lstm_out)
    pooled = jnp.max(lstm_out, axis=2)  # max_pool1d over full length
    pooled = jnp.tanh(pooled)
    return pooled @ params["w_out"].T + params["b_out"][None, :]


if __name__ == "__main__":
    # Small shapes consistent with the module's forward.
    V, D, H, C = 50, 32, 32, 5   # vocab, embed_dim, lstm_hidden_dim, class_num
    T, B = 8, 2                  # seq_len, batch

    key = jax.random.PRNGKey(0)
    kp, kx = jax.random.split(key)
    params = make_params(kp, V, D, H, C)
    kparams = prepare_kernel_params(params)   # one-time weight prep, outside jit hot path
    token_ids = jax.random.randint(kx, (T, B), 0, V, dtype=jnp.int32)

    logits = lstm_model_forward(token_ids, kparams)
    logits = jax.block_until_ready(logits)

    ref = reference_forward(token_ids, params)
    np.testing.assert_allclose(np.asarray(logits), np.asarray(ref),
                               rtol=1e-3, atol=1e-4)

    print("KERNEL_OK")
</pallas_src>

<mosaic_0001>
module attributes {stable_mosaic.version = 11 : i64} {
  func.func @lstm_forward_kernel(%arg0: memref<64x1xi32, #tpu.memory_space<vmem>>, %arg1: memref<50x128xf32, #tpu.memory_space<vmem>>, %arg2: memref<32x128xf32, #tpu.memory_space<vmem>>, %arg3: memref<32x5xf32, #tpu.memory_space<vmem>>, %arg4: memref<1x5xf32, #tpu.memory_space<vmem>>, %arg5: memref<8x5xf32, #tpu.memory_space<vmem>>) attributes {dimension_semantics = [], scalar_prefetch = 0 : i64, scratch_operands = 0 : i64, tpu.core_type = #tpu.core_type<tc>} {
    %c0 = arith.constant 0 : index
    %c0_0 = arith.constant 0 : index
    %0 = vector.load %arg0[%c0, %c0_0] : memref<64x1xi32, #tpu.memory_space<vmem>>, vector<64x1xi32>
    %1 = tpu.iota {dimensions = array<i32: 1>} : vector<64x50xi32>
    %2 = vector.broadcast %0 : vector<64x1xi32> to vector<64x50xi32>
    %3 = arith.cmpi eq, %2, %1 : vector<64x50xi32>
    %4 = arith.extui %3 : vector<64x50xi1> to vector<64x50xi32>
    %5 = arith.sitofp %4 : vector<64x50xi32> to vector<64x50xf32>
    %c0_1 = arith.constant 0 : index
    %c0_2 = arith.constant 0 : index
    %6 = vector.load %arg1[%c0_1, %c0_2] : memref<50x128xf32, #tpu.memory_space<vmem>>, vector<50x128xf32>
    %cst = arith.constant dense<0.000000e+00> : vector<64x128xf32>
    %7 = tpu.matmul %5, %6, %cst {dimension_numbers = #tpu.dot_dimension_numbers<[1], [0], [0], [1], [0, 0, 1, 1], [], []>} : vector<64x50xf32>, vector<50x128xf32>, vector<64x128xf32> -> vector<64x128xf32>
    %8 = vector.shape_cast %7 : vector<64x128xf32> to vector<8x8x128xf32>
    %c0_3 = arith.constant 0 : index
    %c0_4 = arith.constant 0 : index
    %9 = vector.load %arg2[%c0_3, %c0_4] : memref<32x128xf32, #tpu.memory_space<vmem>>, vector<32x128xf32>
    %cst_5 = arith.constant 0.000000e+00 : f32
    %10 = vector.broadcast %cst_5 : f32 to vector<8x32xf32>
    %cst_6 = arith.constant 0.000000e+00 : f32
    %11 = vector.broadcast %cst_6 : f32 to vector<8x32xf32>
    %12 = vector.extract_strided_slice %8 {offsets = [0, 0, 0], sizes = [1, 8, 128], strides = [1, 1, 1]} : vector<8x8x128xf32> to vector<1x8x128xf32>
    %13 = vector.shape_cast %12 : vector<1x8x128xf32> to vector<8x128xf32>
    %cst_7 = arith.constant dense<0.000000e+00> : vector<8x128xf32>
    %14 = tpu.matmul %10, %9, %cst_7 {dimension_numbers = #tpu.dot_dimension_numbers<[1], [0], [0], [1], [0, 0, 1, 1], [], []>} : vector<8x32xf32>, vector<32x128xf32>, vector<8x128xf32> -> vector<8x128xf32>
    %15 = arith.addf %13, %14 : vector<8x128xf32>
    %16 = arith.negf %15 : vector<8x128xf32>
    %17 = math.exp %16 : vector<8x128xf32>
    %cst_8 = arith.constant 1.000000e+00 : f32
    %18 = vector.broadcast %cst_8 : f32 to vector<8x128xf32>
    %19 = arith.addf %18, %17 : vector<8x128xf32>
    %20 = arith.divf %18, %19 : vector<8x128xf32>
    %21 = vector.extract_strided_slice %20 {offsets = [0, 0], sizes = [8, 32], strides = [1, 1]} : vector<8x128xf32> to vector<8x32xf32>
    %22 = vector.extract_strided_slice %20 {offsets = [0, 32], sizes = [8, 32], strides = [1, 1]} : vector<8x128xf32> to vector<8x32xf32>
    %23 = vector.extract_strided_slice %20 {offsets = [0, 64], sizes = [8, 32], strides = [1, 1]} : vector<8x128xf32> to vector<8x32xf32>
    %cst_9 = arith.constant 2.000000e+00 : f32
    %24 = vector.broadcast %cst_9 : f32 to vector<8x32xf32>
    %25 = arith.mulf %24, %23 : vector<8x32xf32>
    %cst_10 = arith.constant 1.000000e+00 : f32
    %26 = vector.broadcast %cst_10 : f32 to vector<8x32xf32>
    %27 = arith.subf %25, %26 : vector<8x32xf32>
    %28 = vector.extract_strided_slice %20 {offsets = [0, 96], sizes = [8, 32], strides = [1, 1]} : vector<8x128xf32> to vector<8x32xf32>
    %29 = arith.mulf %22, %11 : vector<8x32xf32>
    %30 = arith.mulf %21, %27 : vector<8x32xf32>
    %31 = arith.addf %29, %30 : vector<8x32xf32>
    %32 = math.tanh %31 : vector<8x32xf32>
    %33 = arith.mulf %28, %32 : vector<8x32xf32>
    %34 = vector.extract_strided_slice %8 {offsets = [1, 0, 0], sizes = [1, 8, 128], strides = [1, 1, 1]} : vector<8x8x128xf32> to vector<1x8x128xf32>
    %35 = vector.shape_cast %34 : vector<1x8x128xf32> to vector<8x128xf32>
    %cst_11 = arith.constant dense<0.000000e+00> : vector<8x128xf32>
    %36 = tpu.matmul %33, %9, %cst_11 {dimension_numbers = #tpu.dot_dimension_numbers<[1], [0], [0], [1], [0, 0, 1, 1], [], []>} : vector<8x32xf32>, vector<32x128xf32>, vector<8x128xf32> -> vector<8x128xf32>
    %37 = arith.addf %35, %36 : vector<8x128xf32>
    %38 = arith.negf %37 : vector<8x128xf32>
    %39 = math.exp %38 : vector<8x128xf32>
    %cst_12 = arith.constant 1.000000e+00 : f32
    %40 = vector.broadcast %cst_12 : f32 to vector<8x128xf32>
    %41 = arith.addf %40, %39 : vector<8x128xf32>
    %42 = arith.divf %40, %41 : vector<8x128xf32>
    %43 = vector.extract_strided_slice %42 {offsets = [0, 0], sizes = [8, 32], strides = [1, 1]} : vector<8x128xf32> to vector<8x32xf32>
    %44 = vector.extract_strided_slice %42 {offsets = [0, 32], sizes = [8, 32], strides = [1, 1]} : vector<8x128xf32> to vector<8x32xf32>
    %45 = vector.extract_strided_slice %42 {offsets = [0, 64], sizes = [8, 32], strides = [1, 1]} : vector<8x128xf32> to vector<8x32xf32>
    %cst_13 = arith.constant 2.000000e+00 : f32
    %46 = vector.broadcast %cst_13 : f32 to vector<8x32xf32>
    %47 = arith.mulf %46, %45 : vector<8x32xf32>
    %cst_14 = arith.constant 1.000000e+00 : f32
    %48 = vector.broadcast %cst_14 : f32 to vector<8x32xf32>
    %49 = arith.subf %47, %48 : vector<8x32xf32>
    %50 = vector.extract_strided_slice %42 {offsets = [0, 96], sizes = [8, 32], strides = [1, 1]} : vector<8x128xf32> to vector<8x32xf32>
    %51 = arith.mulf %44, %31 : vector<8x32xf32>
    %52 = arith.mulf %43, %49 : vector<8x32xf32>
    %53 = arith.addf %51, %52 : vector<8x32xf32>
    %54 = math.tanh %53 : vector<8x32xf32>
    %55 = arith.mulf %50, %54 : vector<8x32xf32>
    %56 = arith.maximumf %33, %55 : vector<8x32xf32>
    %57 = vector.extract_strided_slice %8 {offsets = [2, 0, 0], sizes = [1, 8, 128], strides = [1, 1, 1]} : vector<8x8x128xf32> to vector<1x8x128xf32>
    %58 = vector.shape_cast %57 : vector<1x8x128xf32> to vector<8x128xf32>
    %cst_15 = arith.constant dense<0.000000e+00> : vector<8x128xf32>
    %59 = tpu.matmul %55, %9, %cst_15 {dimension_numbers = #tpu.dot_dimension_numbers<[1], [0], [0], [1], [0, 0, 1, 1], [], []>} : vector<8x32xf32>, vector<32x128xf32>, vector<8x128xf32> -> vector<8x128xf32>
    %60 = arith.addf %58, %59 : vector<8x128xf32>
    %61 = arith.negf %60 : vector<8x128xf32>
    %62 = math.exp %61 : vector<8x128xf32>
    %cst_16 = arith.constant 1.000000e+00 : f32
    %63 = vector.broadcast %cst_16 : f32 to vector<8x128xf32>
    %64 = arith.addf %63, %62 : vector<8x128xf32>
    %65 = arith.divf %63, %64 : vector<8x128xf32>
    %66 = vector.extract_strided_slice %65 {offsets = [0, 0], sizes = [8, 32], strides = [1, 1]} : vector<8x128xf32> to vector<8x32xf32>
    %67 = vector.extract_strided_slice %65 {offsets = [0, 32], sizes = [8, 32], strides = [1, 1]} : vector<8x128xf32> to vector<8x32xf32>
    %68 = vector.extract_strided_slice %65 {offsets = [0, 64], sizes = [8, 32], strides = [1, 1]} : vector<8x128xf32> to vector<8x32xf32>
    %cst_17 = arith.constant 2.000000e+00 : f32
    %69 = vector.broadcast %cst_17 : f32 to vector<8x32xf32>
    %70 = arith.mulf %69, %68 : vector<8x32xf32>
    %cst_18 = arith.constant 1.000000e+00 : f32
    %71 = vector.broadcast %cst_18 : f32 to vector<8x32xf32>
    %72 = arith.subf %70, %71 : vector<8x32xf32>
    %73 = vector.extract_strided_slice %65 {offsets = [0, 96], sizes = [8, 32], strides = [1, 1]} : vector<8x128xf32> to vector<8x32xf32>
    %74 = arith.mulf %67, %53 : vector<8x32xf32>
    %75 = arith.mulf %66, %72 : vector<8x32xf32>
    %76 = arith.addf %74, %75 : vector<8x32xf32>
    %77 = math.tanh %76 : vector<8x32xf32>
    %78 = arith.mulf %73, %77 : vector<8x32xf32>
    %79 = arith.maximumf %56, %78 : vector<8x32xf32>
    %80 = vector.extract_strided_slice %8 {offsets = [3, 0, 0], sizes = [1, 8, 128], strides = [1, 1, 1]} : vector<8x8x128xf32> to vector<1x8x128xf32>
    %81 = vector.shape_cast %80 : vector<1x8x128xf32> to vector<8x128xf32>
    %cst_19 = arith.constant dense<0.000000e+00> : vector<8x128xf32>
    %82 = tpu.matmul %78, %9, %cst_19 {dimension_numbers = #tpu.dot_dimension_numbers<[1], [0], [0], [1], [0, 0, 1, 1], [], []>} : vector<8x32xf32>, vector<32x128xf32>, vector<8x128xf32> -> vector<8x128xf32>
    %83 = arith.addf %81, %82 : vector<8x128xf32>
    %84 = arith.negf %83 : vector<8x128xf32>
    %85 = math.exp %84 : vector<8x128xf32>
    %cst_20 = arith.constant 1.000000e+00 : f32
    %86 = vector.broadcast %cst_20 : f32 to vector<8x128xf32>
    %87 = arith.addf %86, %85 : vector<8x128xf32>
    %88 = arith.divf %86, %87 : vector<8x128xf32>
    %89 = vector.extract_strided_slice %88 {offsets = [0, 0], sizes = [8, 32], strides = [1, 1]} : vector<8x128xf32> to vector<8x32xf32>
    %90 = vector.extract_strided_slice %88 {offsets = [0, 32], sizes = [8, 32], strides = [1, 1]} : vector<8x128xf32> to vector<8x32xf32>
    %91 = vector.extract_strided_slice %88 {offsets = [0, 64], sizes = [8, 32], strides = [1, 1]} : vector<8x128xf32> to vector<8x32xf32>
    %cst_21 = arith.constant 2.000000e+00 : f32
    %92 = vector.broadcast %cst_21 : f32 to vector<8x32xf32>
    %93 = arith.mulf %92, %91 : vector<8x32xf32>
    %cst_22 = arith.constant 1.000000e+00 : f32
    %94 = vector.broadcast %cst_22 : f32 to vector<8x32xf32>
    %95 = arith.subf %93, %94 : vector<8x32xf32>
    %96 = vector.extract_strided_slice %88 {offsets = [0, 96], sizes = [8, 32], strides = [1, 1]} : vector<8x128xf32> to vector<8x32xf32>
    %97 = arith.mulf %90, %76 : vector<8x32xf32>
    %98 = arith.mulf %89, %95 : vector<8x32xf32>
    %99 = arith.addf %97, %98 : vector<8x32xf32>
    %100 = math.tanh %99 : vector<8x32xf32>
    %101 = arith.mulf %96, %100 : vector<8x32xf32>
    %102 = arith.maximumf %79, %101 : vector<8x32xf32>
    %103 = vector.extract_strided_slice %8 {offsets = [4, 0, 0], sizes = [1, 8, 128], strides = [1, 1, 1]} : vector<8x8x128xf32> to vector<1x8x128xf32>
    %104 = vector.shape_cast %103 : vector<1x8x128xf32> to vector<8x128xf32>
    %cst_23 = arith.constant dense<0.000000e+00> : vector<8x128xf32>
    %105 = tpu.matmul %101, %9, %cst_23 {dimension_numbers = #tpu.dot_dimension_numbers<[1], [0], [0], [1], [0, 0, 1, 1], [], []>} : vector<8x32xf32>, vector<32x128xf32>, vector<8x128xf32> -> vector<8x128xf32>
    %106 = arith.addf %104, %105 : vector<8x128xf32>
    %107 = arith.negf %106 : vector<8x128xf32>
    %108 = math.exp %107 : vector<8x128xf32>
    %cst_24 = arith.constant 1.000000e+00 : f32
    %109 = vector.broadcast %cst_24 : f32 to vector<8x128xf32>
    %110 = arith.addf %109, %108 : vector<8x128xf32>
    %111 = arith.divf %109, %110 : vector<8x128xf32>
    %112 = vector.extract_strided_slice %111 {offsets = [0, 0], sizes = [8, 32], strides = [1, 1]} : vector<8x128xf32> to vector<8x32xf32>
    %113 = vector.extract_strided_slice %111 {offsets = [0, 32], sizes = [8, 32], strides = [1, 1]} : vector<8x128xf32> to vector<8x32xf32>
    %114 = vector.extract_strided_slice %111 {offsets = [0, 64], sizes = [8, 32], strides = [1, 1]} : vector<8x128xf32> to vector<8x32xf32>
    %cst_25 = arith.constant 2.000000e+00 : f32
    %115 = vector.broadcast %cst_25 : f32 to vector<8x32xf32>
    %116 = arith.mulf %115, %114 : vector<8x32xf32>
    %cst_26 = arith.constant 1.000000e+00 : f32
    %117 = vector.broadcast %cst_26 : f32 to vector<8x32xf32>
    %118 = arith.subf %116, %117 : vector<8x32xf32>
    %119 = vector.extract_strided_slice %111 {offsets = [0, 96], sizes = [8, 32], strides = [1, 1]} : vector<8x128xf32> to vector<8x32xf32>
    %120 = arith.mulf %113, %99 : vector<8x32xf32>
    %121 = arith.mulf %112, %118 : vector<8x32xf32>
    %122 = arith.addf %120, %121 : vector<8x32xf32>
    %123 = math.tanh %122 : vector<8x32xf32>
    %124 = arith.mulf %119, %123 : vector<8x32xf32>
    %125 = arith.maximumf %102, %124 : vector<8x32xf32>
    %126 = vector.extract_strided_slice %8 {offsets = [5, 0, 0], sizes = [1, 8, 128], strides = [1, 1, 1]} : vector<8x8x128xf32> to vector<1x8x128xf32>
    %127 = vector.shape_cast %126 : vector<1x8x128xf32> to vector<8x128xf32>
    %cst_27 = arith.constant dense<0.000000e+00> : vector<8x128xf32>
    %128 = tpu.matmul %124, %9, %cst_27 {dimension_numbers = #tpu.dot_dimension_numbers<[1], [0], [0], [1], [0, 0, 1, 1], [], []>} : vector<8x32xf32>, vector<32x128xf32>, vector<8x128xf32> -> vector<8x128xf32>
    %129 = arith.addf %127, %128 : vector<8x128xf32>
    %130 = arith.negf %129 : vector<8x128xf32>
    %131 = math.exp %130 : vector<8x128xf32>
    %cst_28 = arith.constant 1.000000e+00 : f32
    %132 = vector.broadcast %cst_28 : f32 to vector<8x128xf32>
    %133 = arith.addf %132, %131 : vector<8x128xf32>
    %134 = arith.divf %132, %133 : vector<8x128xf32>
    %135 = vector.extract_strided_slice %134 {offsets = [0, 0], sizes = [8, 32], strides = [1, 1]} : vector<8x128xf32> to vector<8x32xf32>
    %136 = vector.extract_strided_slice %134 {offsets = [0, 32], sizes = [8, 32], strides = [1, 1]} : vector<8x128xf32> to vector<8x32xf32>
    %137 = vector.extract_strided_slice %134 {offsets = [0, 64], sizes = [8, 32], strides = [1, 1]} : vector<8x128xf32> to vector<8x32xf32>
    %cst_29 = arith.constant 2.000000e+00 : f32
    %138 = vector.broadcast %cst_29 : f32 to vector<8x32xf32>
    %139 = arith.mulf %138, %137 : vector<8x32xf32>
    %cst_30 = arith.constant 1.000000e+00 : f32
    %140 = vector.broadcast %cst_30 : f32 to vector<8x32xf32>
    %141 = arith.subf %139, %140 : vector<8x32xf32>
    %142 = vector.extract_strided_slice %134 {offsets = [0, 96], sizes = [8, 32], strides = [1, 1]} : vector<8x128xf32> to vector<8x32xf32>
    %143 = arith.mulf %136, %122 : vector<8x32xf32>
    %144 = arith.mulf %135, %141 : vector<8x32xf32>
    %145 = arith.addf %143, %144 : vector<8x32xf32>
    %146 = math.tanh %145 : vector<8x32xf32>
    %147 = arith.mulf %142, %146 : vector<8x32xf32>
    %148 = arith.maximumf %125, %147 : vector<8x32xf32>
    %149 = vector.extract_strided_slice %8 {offsets = [6, 0, 0], sizes = [1, 8, 128], strides = [1, 1, 1]} : vector<8x8x128xf32> to vector<1x8x128xf32>
    %150 = vector.shape_cast %149 : vector<1x8x128xf32> to vector<8x128xf32>
    %cst_31 = arith.constant dense<0.000000e+00> : vector<8x128xf32>
    %151 = tpu.matmul %147, %9, %cst_31 {dimension_numbers = #tpu.dot_dimension_numbers<[1], [0], [0], [1], [0, 0, 1, 1], [], []>} : vector<8x32xf32>, vector<32x128xf32>, vector<8x128xf32> -> vector<8x128xf32>
    %152 = arith.addf %150, %151 : vector<8x128xf32>
    %153 = arith.negf %152 : vector<8x128xf32>
    %154 = math.exp %153 : vector<8x128xf32>
    %cst_32 = arith.constant 1.000000e+00 : f32
    %155 = vector.broadcast %cst_32 : f32 to vector<8x128xf32>
    %156 = arith.addf %155, %154 : vector<8x128xf32>
    %157 = arith.divf %155, %156 : vector<8x128xf32>
    %158 = vector.extract_strided_slice %157 {offsets = [0, 0], sizes = [8, 32], strides = [1, 1]} : vector<8x128xf32> to vector<8x32xf32>
    %159 = vector.extract_strided_slice %157 {offsets = [0, 32], sizes = [8, 32], strides = [1, 1]} : vector<8x128xf32> to vector<8x32xf32>
    %160 = vector.extract_strided_slice %157 {offsets = [0, 64], sizes = [8, 32], strides = [1, 1]} : vector<8x128xf32> to vector<8x32xf32>
    %cst_33 = arith.constant 2.000000e+00 : f32
    %161 = vector.broadcast %cst_33 : f32 to vector<8x32xf32>
    %162 = arith.mulf %161, %160 : vector<8x32xf32>
    %cst_34 = arith.constant 1.000000e+00 : f32
    %163 = vector.broadcast %cst_34 : f32 to vector<8x32xf32>
    %164 = arith.subf %162, %163 : vector<8x32xf32>
    %165 = vector.extract_strided_slice %157 {offsets = [0, 96], sizes = [8, 32], strides = [1, 1]} : vector<8x128xf32> to vector<8x32xf32>
    %166 = arith.mulf %159, %145 : vector<8x32xf32>
    %167 = arith.mulf %158, %164 : vector<8x32xf32>
    %168 = arith.addf %166, %167 : vector<8x32xf32>
    %169 = math.tanh %168 : vector<8x32xf32>
    %170 = arith.mulf %165, %169 : vector<8x32xf32>
    %171 = arith.maximumf %148, %170 : vector<8x32xf32>
    %172 = vector.extract_strided_slice %8 {offsets = [7, 0, 0], sizes = [1, 8, 128], strides = [1, 1, 1]} : vector<8x8x128xf32> to vector<1x8x128xf32>
    %173 = vector.shape_cast %172 : vector<1x8x128xf32> to vector<8x128xf32>
    %cst_35 = arith.constant dense<0.000000e+00> : vector<8x128xf32>
    %174 = tpu.matmul %170, %9, %cst_35 {dimension_numbers = #tpu.dot_dimension_numbers<[1], [0], [0], [1], [0, 0, 1, 1], [], []>} : vector<8x32xf32>, vector<32x128xf32>, vector<8x128xf32> -> vector<8x128xf32>
    %175 = arith.addf %173, %174 : vector<8x128xf32>
    %176 = arith.negf %175 : vector<8x128xf32>
    %177 = math.exp %176 : vector<8x128xf32>
    %cst_36 = arith.constant 1.000000e+00 : f32
    %178 = vector.broadcast %cst_36 : f32 to vector<8x128xf32>
    %179 = arith.addf %178, %177 : vector<8x128xf32>
    %180 = arith.divf %178, %179 : vector<8x128xf32>
    %181 = vector.extract_strided_slice %180 {offsets = [0, 0], sizes = [8, 32], strides = [1, 1]} : vector<8x128xf32> to vector<8x32xf32>
    %182 = vector.extract_strided_slice %180 {offsets = [0, 32], sizes = [8, 32], strides = [1, 1]} : vector<8x128xf32> to vector<8x32xf32>
    %183 = vector.extract_strided_slice %180 {offsets = [0, 64], sizes = [8, 32], strides = [1, 1]} : vector<8x128xf32> to vector<8x32xf32>
    %cst_37 = arith.constant 2.000000e+00 : f32
    %184 = vector.broadcast %cst_37 : f32 to vector<8x32xf32>
    %185 = arith.mulf %184, %183 : vector<8x32xf32>
    %cst_38 = arith.constant 1.000000e+00 : f32
    %186 = vector.broadcast %cst_38 : f32 to vector<8x32xf32>
    %187 = arith.subf %185, %186 : vector<8x32xf32>
    %188 = vector.extract_strided_slice %180 {offsets = [0, 96], sizes = [8, 32], strides = [1, 1]} : vector<8x128xf32> to vector<8x32xf32>
    %189 = arith.mulf %182, %168 : vector<8x32xf32>
    %190 = arith.mulf %181, %187 : vector<8x32xf32>
    %191 = arith.addf %189, %190 : vector<8x32xf32>
    %192 = math.tanh %191 : vector<8x32xf32>
    %193 = arith.mulf %188, %192 : vector<8x32xf32>
    %194 = arith.maximumf %171, %193 : vector<8x32xf32>
    %195 = math.tanh %194 : vector<8x32xf32>
    %196 = math.tanh %195 : vector<8x32xf32>
    %c0_39 = arith.constant 0 : index
    %c0_40 = arith.constant 0 : index
    %197 = vector.load %arg3[%c0_39, %c0_40] : memref<32x5xf32, #tpu.memory_space<vmem>>, vector<32x5xf32>
    %cst_41 = arith.constant dense<0.000000e+00> : vector<8x5xf32>
    %198 = tpu.matmul %196, %197, %cst_41 {dimension_numbers = #tpu.dot_dimension_numbers<[1], [0], [0], [1], [0, 0, 1, 1], [], []>} : vector<8x32xf32>, vector<32x5xf32>, vector<8x5xf32> -> vector<8x5xf32>
    %c0_42 = arith.constant 0 : index
    %c0_43 = arith.constant 0 : index
    %199 = vector.load %arg4[%c0_42, %c0_43] : memref<1x5xf32, #tpu.memory_space<vmem>>, vector<1x5xf32>
    %200 = vector.broadcast %199 : vector<1x5xf32> to vector<8x5xf32>
    %201 = arith.addf %198, %200 : vector<8x5xf32>
    %c0_44 = arith.constant 0 : index
    %c0_45 = arith.constant 0 : index
    %202 = vector.load %arg5[%c0_44, %c0_45] : memref<8x5xf32, #tpu.memory_space<vmem>>, vector<8x5xf32>
    tpu.vector_store %arg5[%c0_44, %c0_45], %201 {strides = array<i32>} : memref<8x5xf32, #tpu.memory_space<vmem>>, vector<8x5xf32>,
    return
  }
}

</mosaic_0001>

<bundles_post_ra>
// kernel: lstm_model_forward.1
= control target key start
LH: loop header
LB: loop body
LE: loop exit
PB: predicated region body
PF: predicated region fallthrough
CT: control target
= control target key end

     0   :  { %v1484_v0 = vmov 0   ;;  %v1485_v4 = vmov 0.0|0.0   ;;  %vm1486_vm0 = vmmov 0   ;;  %v1487_v19 = vmov 0.0   ;;  %s1489_s18 = smov 32   ;;  %s1737_s0 = inlined_call_operand.vmem [shape: s32[64,1], index: 0, kind: input, shape index: {}]   ;;  %s1738_s1 = inlined_call_operand.vmem [shape: f32[50,128], index: 1, kind: input, shape index: {}]   ;;  %s1739_s2 = inlined_call_operand.vmem [shape: f32[32,128], index: 2, kind: input, shape index: {}]   ;;  %s1740_s3 = inlined_call_operand.vmem [shape: f32[32,5], index: 3, kind: input, shape index: {}]   ;;  %s1741_s4 = inlined_call_operand.vmem [shape: f32[1,5], index: 4, kind: input, shape index: {}]   ;;  %s1742_s5 = inlined_call_operand.vmem [shape: f32[8,5], index: 5, kind: output, shape index: {}]  }
   0x1   :  { %1430 = vset.pattern.permute.xlu0 %v1484_v0  ;;  %v20_v1 = vld [vmem:[%s1737_s0] sm:$0xff]  ;;  %v21_v2 = vld [vmem:[%s1737_s0 + $0x8] sm:$0xff]  ;;  %1370 = vmatprep.subr.bf16.mxu1 %v1485_v4  ;;  %v80_v6 = vld [vmem:[%s1738_s1 + $0x10] sm:$0xff]  ;;  %vm110_vm1 = vcmask 1041408   ;;  %v28_v21 = vlaneseq  ;;  %vm85_vm2 = vcmask 408576   ;;  %vm223_vm5 = vcmask 261120  }
   0x2   :  { %v78_v3 = vld [vmem:[%s1738_s1] sm:$0xff]  ;;  %31 = vperm.xlu0 %1430, %v20_v1   ;;  %v79_v5 = vld [vmem:[%s1738_s1 + $0x8] sm:$0xff]  ;;  %v81_v7 = vld [vmem:[%s1738_s1 + $0x18] sm:$0xff]  ;;  %1431 = vset.pattern.permute.xlu1 %v1484_v0  ;;  %vm1125_vm12 = vcmask 39936  }
   0x3   :  { %v1358_v8 = vpack.c.bf16 %v79_v5, %v78_v3  ;;  %v1362_v9 = vpack.c.bf16 %v81_v7, %v80_v6  ;;  %v219_v10 = vld [vmem:[%s1739_s2] sm:$0xff]  ;;  %v220_v11 = vld [vmem:[%s1739_s2 + $0x8] sm:$0xff]  ;;  %v221_v15 = vld [vmem:[%s1739_s2 + $0x10] sm:$0xff]  ;;  %1267 = vmatprep.mubr.msk.f32.mxu1 %vm1486_vm0, %v1487_v19  ;;  %v1578_v22 = vand.u32 127, %v28_v21 }
   0x4   :  { %v82_v12 = vld [vmem:[%s1738_s1 + $0x20] sm:$0xff]  ;;  %v1548_v13 = vpack.c.bf16 %v220_v11, %v219_v10  ;;  %v83_v14 = vld [vmem:[%s1738_s1 + $0x28] sm:$0xff]  ;;  %v222_v16 = vld [vmem:[%s1739_s2 + $0x18] sm:$0xff] }
   0x5   :  { %1359 = vmatprep.subr.bf16.mxu0 %v1358_v8  ;;  %v1366_v17 = vpack.c.bf16 %v83_v14, %v82_v12  ;;  %v1560_v18 = vpack.c.bf16 %v222_v16, %v221_v15  ;;  %v84_v20 = vld [vmem:[%s1738_s1 + $0x30] sm:$0x3]  ;;  %s1488_s1 = smov 64   ;;  %v23_v63 = vld [vmem:[%s1737_s0 + $0x18] sm:$0xff] }
   0x6   :  { %34 = vperm.xlu0 %1430, %v21_v2   ;;  %1361 = vmatpush3.bf16.msra.mxu0 %v1358_v8  ;;  %v22_v58 = vld [vmem:[%s1737_s0 + $0x10] sm:$0xff] }
   0x7   :  { %1363 = vmatprep.subr.bf16.mxu0 %v1362_v9  ;;  %1372 = vmatpush3.bf16.msra.mxu1 %v1548_v13 }
   0x8   :  { %1373 = vmatprep.subr.bf16.mxu1 %v1485_v4 }
   0xa   :  { %1365 = vmatpush3.bf16.msra.mxu0 %v1362_v9 }
   0xb   :  { %1367 = vmatprep.subr.bf16.mxu0 %v1366_v17  ;;  %1375 = vmatpush3.bf16.msra.mxu1 %v1560_v18 }
   0xc   :  { %1376 = vmatprep.subr.bf16.mxu1 %v1485_v4 }
   0xe   :  { %1369 = vmatpush3.bf16.msra.mxu0 %v1366_v17  ;;  %1268 = vmatmul.mubr.f32.vlgmr.msra.gmra.mrb[0].mxu1 %v1487_v19 }
   0xf   :  { %1245 = vmatprep.subr.msk.mxu0 %vm110_vm1, %v84_v20  ;;  %1378 = vmatpush3.bf16.msra.mxu1 %v1548_v13 }
  0x10   :  { %1379 = vmatprep.subr.bf16.mxu1 %v1485_v4  ;;  %1278 = vmatprep.mubr.msk.f32.mxu1 %vm1486_vm0, %v1487_v19 }
  0x12   :  { %1246 = vmatpush3.msk.msra.mxu0 %vm110_vm1, %v84_v20 }
  0x13   :  { %1381 = vmatpush3.bf16.msra.mxu1 %v1560_v18  ;;  %1388 = vmatprep.subr.bf16.mxu0 %v1485_v4 }
  0x14   :  { %1382 = vmatprep.subr.bf16.mxu1 %v1485_v4 }
  0x81   :  { %v32_v23 = vpop.permute.xlu0 %31 }
  0x82   :  { %vm54_vm3 = vcmp.eq.s32.totalorder %v32_v23, %v1578_v22 }
  0x83   :  { %v1131_v24 = vsel %vm54_vm3, 1.0, %v1487_v19 }
  0x84   :  { %1247 = vmatprep.mubr.msk.f32.mxu0 %vm85_vm2, %v1131_v24 }
  0x85   :  { %v35_v25 = vpop.permute.xlu0 %34 }
  0x86   :  { %vm55_vm4 = vcmp.eq.s32.totalorder %v35_v25, %v1578_v22  ;;  %v24_v25 = vld [vmem:[%s1737_s0 + $0x20] sm:$0xff] }
  0x87   :  { %v1132_v26 = vsel %vm55_vm4, 1.0, %v1487_v19 }
  0x88   :  { %1248 = vmatmul.mubr.msk.f32.vlgmr.msra.gmra.mrb[0].mxu0 %vm85_vm2, %v1132_v26  ;;  %v26_v26 = vld [vmem:[%s1737_s0 + $0x30] sm:$0xff] }
  0x89   :  { %1390 = vmatpush3.bf16.msra.mxu0 %v1548_v13 }
  0x8a   :  { %1391 = vmatprep.subr.bf16.mxu0 %v1485_v4 }
  0x8d   :  { %1393 = vmatpush3.bf16.msra.mxu0 %v1560_v18 }
  0x8e   :  { %1400 = vmatprep.subr.bf16.mxu0 %v1485_v4 }
  0xe1   :  { %v293_v27 = vpop.f32.mrb[0].mxu1 }
  0xe2   :  { %v1269_v28 = vpop.f32.mrb[1].mxu1 }
 0x15b   :  { %v1249_v29 = vpop.f32.mrb[0].mxu0 }
 0x15c   :  { %v180_v30 = vpop.f32.mrb[1].mxu0 }
 0x15d   :  { %v297_v31 = vadd.f32 %v293_v27, %v180_v30 }
 0x15f   :  { %v1148_v32 = vmul.f32 -1.442695, %v297_v31  ;;  %v25_v31 = vld [vmem:[%s1737_s0 + $0x28] sm:$0xff] }
 0x161   :  { %1432 = vpow2.f32 %v1148_v32 }
 0x16b   :  { %v1433_v33 = vpop.eup %1432 }
 0x16c   :  { %v301_v34 = vadd.f32 1.0, %v1433_v33 }
 0x16e   :  { %1434 = vrcp.f32 %v301_v34  ;;  %v27_v34 = vld [vmem:[%s1737_s0 + $0x38] sm:$0xff] }
 0x178   :  { %v1435_v35 = vpop.eup %1434 }
 0x179   :  { %v304_v36 = vmul.f32 2.0, %v1435_v35  ;;  %v306_v40 = vmul.f32 0.0, %v1435_v35 }
 0x17b   :  { %v1149_v37 = vadd.f32 -1.0, %v304_v36 }
 0x17d   :  { %308 = vrot.lane.b32.xlu1 %v1149_v37, %s1488_s1 }
 0x1ef   :  { %v309_v38 = vpop.permute.xlu1 %308 }
 0x1f0   :  { %v311_v39 = vmul.f32 %v1435_v35, %v309_v38 }
 0x1f2   :  { %313 = vrot.lane.b32.xlu1 %v311_v39, %s1489_s18 }
 0x264   :  { %v314_v41 = vpop.permute.xlu1 %313 }
 0x265   :  { %v316_v42 = vadd.f32 %v314_v41, %v306_v40 }
 0x267   :  { %1436 = vtanh.f32 %v316_v42 }
 0x271   :  { %v1437_v43 = vpop.eup %1436 }
 0x272   :  { %319 = vrot.lane.b32.xlu0 %v1437_v43, %s1488_s1 }
 0x2e4   :  { %v320_v44 = vpop.permute.xlu0 %319 }
 0x2e5   :  { %v1593_v45 = vmul.f32 %v1435_v35, %v320_v44 }
 0x2e7   :  { %324 = vrot.lane.b32.xlu1 %v1593_v45, %s1489_s18 }
 0x359   :  { %v325_v46 = vpop.permute.xlu1 %324 }
 0x35a   :  { %1279 = vmatmul.mubr.msk.f32.vlgmr.msra.gmra.mrb[2].mxu1 %vm223_vm5, %v325_v46 }
 0x35b   :  { %1384 = vmatpush3.bf16.msra.mxu1 %v1548_v13  ;;  %1289 = vmatprep.mubr.msk.f32.mxu1 %vm1486_vm0, %v1487_v19 }
 0x35c   :  { %1385 = vmatprep.subr.bf16.mxu1 %v1485_v4 }
 0x35f   :  { %1387 = vmatpush3.bf16.msra.mxu1 %v1560_v18 }
 0x360   :  { %1394 = vmatprep.subr.bf16.mxu1 %v1485_v4 }
 0x42d   :  { %v394_v47 = vpop.f32.mrb[2].mxu1 }
 0x42e   :  { %v398_v48 = vadd.f32 %v1249_v29, %v394_v47  ;;  %v1280_v49 = vpop.f32.mrb[3].mxu1 }
 0x430   :  { %v1151_v50 = vmul.f32 -1.442695, %v398_v48 }
 0x432   :  { %1438 = vpow2.f32 %v1151_v50 }
 0x43c   :  { %v1439_v51 = vpop.eup %1438 }
 0x43d   :  { %v402_v52 = vadd.f32 1.0, %v1439_v51 }
 0x43f   :  { %1440 = vrcp.f32 %v402_v52 }
 0x449   :  { %v1441_v53 = vpop.eup %1440 }
 0x44a   :  { %v405_v54 = vmul.f32 2.0, %v1441_v53  ;;  %v407_v59 = vmul.f32 %v1441_v53, %v316_v42 }
 0x44c   :  { %v1152_v55 = vadd.f32 -1.0, %v405_v54 }
 0x44e   :  { %409 = vrot.lane.b32.xlu0 %v1152_v55, %s1488_s1 }
 0x4c0   :  { %v410_v56 = vpop.permute.xlu0 %409 }
 0x4c1   :  { %v412_v57 = vmul.f32 %v1441_v53, %v410_v56 }
 0x4c3   :  { %414 = vrot.lane.b32.xlu1 %v412_v57, %s1489_s18 }
 0x4c7   :  { %37 = vperm.xlu1 %1431, %v22_v58  }
 0x535   :  { %v415_v60 = vpop.permute.xlu1 %414 }
 0x536   :  { %v417_v61 = vadd.f32 %v415_v60, %v407_v59 }
 0x538   :  { %1442 = vtanh.f32 %v417_v61 }
 0x542   :  { %v1443_v62 = vpop.eup %1442 }
 0x543   :  { %420 = vrot.lane.b32.xlu0 %v1443_v62, %s1488_s1 }
 0x546   :  { %v38_v0 = vpop.permute.xlu1 %37 }
 0x547   :  { %40 = vperm.xlu0 %1430, %v23_v63   ;;  %vm56_vm6 = vcmp.eq.s32.totalorder %v38_v0, %v1578_v22 }
 0x548   :  { %v1133_v1 = vsel %vm56_vm6, 1.0, %v1487_v19 }
 0x549   :  { %1250 = vmatprep.mubr.msk.f32.mxu0 %vm85_vm2, %v1133_v1 }
 0x5b5   :  { %v421_v2 = vpop.permute.xlu0 %420 }
 0x5b6   :  { %v423_v3 = vmul.f32 %v1441_v53, %v421_v2 }
 0x5b8   :  { %426 = vrot.lane.b32.xlu1 %v423_v3, %s1489_s18  ;;  %v424_v36 = vmax.f32 %v1593_v45, %v423_v3 }
 0x5c6   :  { %v41_v5 = vpop.permute.xlu0 %40 }
 0x5c7   :  { %vm57_vm7 = vcmp.eq.s32.totalorder %v41_v5, %v1578_v22 }
 0x5c8   :  { %v1134_v6 = vsel %vm57_vm7, 1.0, %v1487_v19 }
 0x5c9   :  { %1251 = vmatmul.mubr.msk.f32.gmra.mrb[2].mxu0 %vm85_vm2, %v1134_v6 }
 0x62a   :  { %v427_v7 = vpop.permute.xlu1 %426 }
 0x62b   :  { %1290 = vmatmul.mubr.msk.f32.vlgmr.msra.gmra.mrb[4].mxu1 %vm223_vm5, %v427_v7 }
 0x62c   :  { %1396 = vmatpush3.bf16.msra.mxu1 %v1548_v13  ;;  %1311 = vmatprep.mubr.msk.f32.mxu1 %vm1486_vm0, %v1487_v19 }
 0x62d   :  { %1397 = vmatprep.subr.bf16.mxu1 %v1485_v4 }
 0x630   :  { %1399 = vmatpush3.bf16.msra.mxu1 %v1560_v18 }
 0x631   :  { %1406 = vmatprep.subr.bf16.mxu1 %v1485_v4 }
 0x69c   :  { %v1627_v8 = vpop.f32.mrb[2].mxu0 }
 0x69d   :  { %v190_v9 = vpop.f32.mrb[3].mxu0 }
 0x6fe   :  { %v496_v10 = vpop.f32.mrb[4].mxu1 }
 0x6ff   :  { %v500_v11 = vadd.f32 %v496_v10, %v190_v9  ;;  %v1291_v12 = vpop.f32.mrb[5].mxu1 }
 0x701   :  { %v1154_v14 = vmul.f32 -1.442695, %v500_v11 }
 0x703   :  { %1444 = vpow2.f32 %v1154_v14 }
 0x70d   :  { %v1445_v15 = vpop.eup %1444 }
 0x70e   :  { %v504_v16 = vadd.f32 1.0, %v1445_v15 }
 0x710   :  { %1446 = vrcp.f32 %v504_v16 }
 0x71a   :  { %v1447_v17 = vpop.eup %1446 }
 0x71b   :  { %v507_v20 = vmul.f32 2.0, %v1447_v17  ;;  %v509_v27 = vmul.f32 %v1447_v17, %v417_v61 }
 0x71d   :  { %v1155_v21 = vadd.f32 -1.0, %v507_v20 }
 0x71f   :  { %511 = vrot.lane.b32.xlu0 %v1155_v21, %s1488_s1 }
 0x791   :  { %v512_v23 = vpop.permute.xlu0 %511 }
 0x792   :  { %v514_v24 = vmul.f32 %v1447_v17, %v512_v23 }
 0x794   :  { %516 = vrot.lane.b32.xlu1 %v514_v24, %s1489_s18 }
 0x798   :  { %43 = vperm.xlu1 %1431, %v24_v25  }
 0x79c   :  { %49 = vperm.xlu1 %1431, %v26_v26  }
 0x806   :  { %v517_v28 = vpop.permute.xlu1 %516 }
 0x807   :  { %v519_v29 = vadd.f32 %v517_v28, %v509_v27 }
 0x809   :  { %1448 = vtanh.f32 %v519_v29 }
 0x813   :  { %v1449_v30 = vpop.eup %1448 }
 0x814   :  { %522 = vrot.lane.b32.xlu0 %v1449_v30, %s1488_s1 }
 0x817   :  { %v44_v32 = vpop.permute.xlu1 %43 }
 0x818   :  { %vm58_vm8 = vcmp.eq.s32.totalorder %v44_v32, %v1578_v22  ;;  %46 = vperm.xlu0 %1430, %v25_v31  }
 0x819   :  { %v1135_v33 = vsel %vm58_vm8, 1.0, %v1487_v19 }
 0x81a   :  { %1253 = vmatprep.mubr.msk.f32.mxu0 %vm85_vm2, %v1135_v33 }
 0x81b   :  { %v50_v39 = vpop.permute.xlu1 %49 }
 0x81c   :  { %52 = vperm.xlu0 %1430, %v27_v34   ;;  %vm60_vm9 = vcmp.eq.s32.totalorder %v50_v39, %v1578_v22 }
 0x81d   :  { %v1137_v42 = vsel %vm60_vm9, 1.0, %v1487_v19 }
 0x886   :  { %v523_v35 = vpop.permute.xlu0 %522 }
 0x887   :  { %v525_v37 = vmul.f32 %v1447_v17, %v523_v35 }
 0x889   :  { %v1648_v38 = vmax.f32 %v424_v36, %v525_v37  ;;  %528 = vrot.lane.b32.xlu1 %v525_v37, %s1489_s18 }
 0x897   :  { %v47_v40 = vpop.permute.xlu0 %46 }
 0x898   :  { %vm59_vm10 = vcmp.eq.s32.totalorder %v47_v40, %v1578_v22 }
 0x899   :  { %v1136_v41 = vsel %vm59_vm10, 1.0, %v1487_v19 }
 0x89a   :  { %1254 = vmatmul.mubr.msk.f32.gmra.mrb[4].mxu0 %vm85_vm2, %v1136_v41 }
 0x89b   :  { %v53_v43 = vpop.permute.xlu0 %52  ;;  %1256 = vmatprep.mubr.msk.f32.mxu0 %vm85_vm2, %v1137_v42 }
 0x89c   :  { %vm61_vm11 = vcmp.eq.s32.totalorder %v53_v43, %v1578_v22 }
 0x89d   :  { %v1138_v44 = vsel %vm61_vm11, 1.0, %v1487_v19 }
 0x89e   :  { %1257 = vmatmul.mubr.msk.f32.gmra.mrb[6].mxu0 %vm85_vm2, %v1138_v44 }
 0x89f   :  { %1300 = vmatprep.mubr.msk.f32.mxu0 %vm1486_vm0, %v1487_v19 }
 0x8fb   :  { %v529_v45 = vpop.permute.xlu1 %528 }
 0x8fc   :  { %1301 = vmatmul.mubr.msk.f32.vlgmr.msra.gmra.mrb[8].mxu0 %vm223_vm5, %v529_v45 }
 0x8fd   :  { %1402 = vmatpush3.bf16.msra.mxu0 %v1548_v13  ;;  %1322 = vmatprep.mubr.msk.f32.mxu0 %vm1486_vm0, %v1487_v19 }
 0x8fe   :  { %1403 = vmatprep.subr.bf16.mxu0 %v1485_v4 }
 0x901   :  { %1405 = vmatpush3.bf16.msra.mxu0 %v1560_v18 }
 0x902   :  { %1412 = vmatprep.subr.bf16.mxu0 %v1485_v4 }
 0x96d   :  { %v1669_v22 = vpop.f32.mrb[4].mxu0 }
 0x96e   :  { %v200_v46 = vpop.f32.mrb[5].mxu0 }
 0x971   :  { %v1671_v47 = vpop.f32.mrb[6].mxu0 }
 0x972   :  { %v1673_v48 = vpop.f32.mrb[7].mxu0 }
 0x9cf   :  { %v598_v49 = vpop.f32.mrb[8].mxu0 }
 0x9d0   :  { %v602_v50 = vadd.f32 %v1627_v8, %v598_v49  ;;  %v1302_v51 = vpop.f32.mrb[9].mxu0 }
 0x9d2   :  { %v1157_v52 = vmul.f32 -1.442695, %v602_v50 }
 0x9d4   :  { %1450 = vpow2.f32 %v1157_v52 }
 0x9de   :  { %v1451_v53 = vpop.eup %1450 }
 0x9df   :  { %v606_v54 = vadd.f32 1.0, %v1451_v53 }
 0x9e1   :  { %1452 = vrcp.f32 %v606_v54 }
 0x9eb   :  { %v1453_v55 = vpop.eup %1452 }
 0x9ec   :  { %v609_v56 = vmul.f32 2.0, %v1453_v55  ;;  %v611_v60 = vmul.f32 %v1453_v55, %v519_v29 }
 0x9ee   :  { %v1158_v57 = vadd.f32 -1.0, %v609_v56 }
 0x9f0   :  { %613 = vrot.lane.b32.xlu0 %v1158_v57, %s1488_s1 }
 0xa62   :  { %v614_v58 = vpop.permute.xlu0 %613 }
 0xa63   :  { %v616_v59 = vmul.f32 %v1453_v55, %v614_v58 }
 0xa65   :  { %618 = vrot.lane.b32.xlu1 %v616_v59, %s1489_s18 }
 0xad7   :  { %v619_v61 = vpop.permute.xlu1 %618 }
 0xad8   :  { %v621_v62 = vadd.f32 %v619_v61, %v611_v60 }
 0xada   :  { %1454 = vtanh.f32 %v621_v62 }
 0xae4   :  { %v1455_v63 = vpop.eup %1454 }
 0xae5   :  { %624 = vrot.lane.b32.xlu0 %v1455_v63, %s1488_s1 }
 0xb57   :  { %v625_v0 = vpop.permute.xlu0 %624 }
 0xb58   :  { %v627_v1 = vmul.f32 %v1453_v55, %v625_v0 }
 0xb5a   :  { %v628_v2 = vmax.f32 %v1648_v38, %v627_v1  ;;  %630 = vrot.lane.b32.xlu1 %v627_v1, %s1489_s18 }
 0xbcc   :  { %v631_v3 = vpop.permute.xlu1 %630 }
 0xbcd   :  { %1312 = vmatmul.mubr.msk.f32.vlgmr.msra.gmra.mrb[6].mxu1 %vm223_vm5, %v631_v3 }
 0xbce   :  { %1408 = vmatpush3.bf16.msra.mxu1 %v1548_v13  ;;  %1333 = vmatprep.mubr.msk.f32.mxu1 %vm1486_vm0, %v1487_v19 }
 0xbcf   :  { %1409 = vmatprep.subr.bf16.mxu1 %v1485_v4 }
 0xbd2   :  { %1411 = vmatpush3.bf16.msra.mxu1 %v1560_v18 }
 0xbd3   :  { %1418 = vmatprep.subr.bf16.mxu1 %v1485_v4 }
 0xca0   :  { %v700_v5 = vpop.f32.mrb[6].mxu1 }
 0xca1   :  { %v704_v6 = vadd.f32 %v700_v5, %v200_v46  ;;  %v1313_v7 = vpop.f32.mrb[7].mxu1 }
 0xca3   :  { %v1160_v8 = vmul.f32 -1.442695, %v704_v6 }
 0xca5   :  { %1456 = vpow2.f32 %v1160_v8 }
 0xcaf   :  { %v1457_v9 = vpop.eup %1456 }
 0xcb0   :  { %v708_v10 = vadd.f32 1.0, %v1457_v9 }
 0xcb2   :  { %1458 = vrcp.f32 %v708_v10 }
 0xcbc   :  { %v1459_v11 = vpop.eup %1458 }
 0xcbd   :  { %v711_v12 = vmul.f32 2.0, %v1459_v11  ;;  %v713_v17 = vmul.f32 %v1459_v11, %v621_v62 }
 0xcbf   :  { %v1161_v14 = vadd.f32 -1.0, %v711_v12 }
 0xcc1   :  { %715 = vrot.lane.b32.xlu0 %v1161_v14, %s1488_s1 }
 0xd33   :  { %v716_v15 = vpop.permute.xlu0 %715 }
 0xd34   :  { %v718_v16 = vmul.f32 %v1459_v11, %v716_v15  ;;  %v1039_v15 = vld [vmem:[%s1740_s3] sm:$0xff] }
 0xd36   :  { %720 = vrot.lane.b32.xlu1 %v718_v16, %s1489_s18  ;;  %v1040_v16 = vld [vmem:[%s1740_s3 + $0x8] sm:$0xff] }
 0xda8   :  { %v721_v20 = vpop.permute.xlu1 %720 }
 0xda9   :  { %v723_v21 = vadd.f32 %v721_v20, %v713_v17  ;;  %v1041_v17 = vld [vmem:[%s1740_s3 + $0x10] sm:$0xff]  ;;  %v1419_v20 = vpack.c.bf16 %v1040_v16, %v1039_v15 }
 0xdab   :  { %1460 = vtanh.f32 %v723_v21 }
 0xdb5   :  { %v1461_v23 = vpop.eup %1460 }
 0xdb6   :  { %726 = vrot.lane.b32.xlu0 %v1461_v23, %s1488_s1 }
 0xe28   :  { %v727_v24 = vpop.permute.xlu0 %726 }
 0xe29   :  { %v729_v25 = vmul.f32 %v1459_v11, %v727_v24 }
 0xe2b   :  { %v730_v26 = vmax.f32 %v628_v2, %v729_v25  ;;  %732 = vrot.lane.b32.xlu1 %v729_v25, %s1489_s18 }
 0xe9d   :  { %v733_v27 = vpop.permute.xlu1 %732 }
 0xe9e   :  { %1323 = vmatmul.mubr.msk.f32.vlgmr.msra.gmra.mrb[10].mxu0 %vm223_vm5, %v733_v27 }
 0xe9f   :  { %1414 = vmatpush3.bf16.msra.mxu0 %v1548_v13  ;;  %1344 = vmatprep.mubr.msk.f32.mxu0 %vm1486_vm0, %v1487_v19 }
 0xea0   :  { %1415 = vmatprep.subr.bf16.mxu0 %v1485_v4 }
 0xea3   :  { %1417 = vmatpush3.bf16.msra.mxu0 %v1560_v18 }
 0xf71   :  { %v802_v28 = vpop.f32.mrb[10].mxu0 }
 0xf72   :  { %v806_v29 = vadd.f32 %v1669_v22, %v802_v28  ;;  %v1324_v30 = vpop.f32.mrb[11].mxu0 }
 0xf73   :  { %v1171_v30 = vld [vmem:[%s1741_s4] ss:$0 sm:$0xff] }
 0xf74   :  { %v1163_v31 = vmul.f32 -1.442695, %v806_v29 }
 0xf76   :  { %1462 = vpow2.f32 %v1163_v31 }
 0xf80   :  { %v1463_v32 = vpop.eup %1462 }
 0xf81   :  { %v810_v33 = vadd.f32 1.0, %v1463_v32 }
 0xf83   :  { %1464 = vrcp.f32 %v810_v33 }
 0xf8d   :  { %v1465_v34 = vpop.eup %1464 }
 0xf8e   :  { %v813_v35 = vmul.f32 2.0, %v1465_v34  ;;  %v815_v38 = vmul.f32 %v1465_v34, %v723_v21  ;;  %v1042_v21 = vld [vmem:[%s1740_s3 + $0x18] sm:$0xff] }
 0xf8f   :  { %v1422_v23 = vpack.c.bf16 %v1042_v21, %v1041_v17 }
 0xf90   :  { %v1164_v36 = vadd.f32 -1.0, %v813_v35 }
 0xf92   :  { %817 = vrot.lane.b32.xlu0 %v1164_v36, %s1488_s1 }
0x1004   :  { %v818_v13 = vpop.permute.xlu0 %817 }
0x1005   :  { %v820_v37 = vmul.f32 %v1465_v34, %v818_v13 }
0x1007   :  { %822 = vrot.lane.b32.xlu1 %v820_v37, %s1489_s18 }
0x1079   :  { %v823_v18 = vpop.permute.xlu1 %822 }
0x107a   :  { %v825_v39 = vadd.f32 %v823_v18, %v815_v38 }
0x107c   :  { %1466 = vtanh.f32 %v825_v39 }
0x1086   :  { %v1467_v40 = vpop.eup %1466 }
0x1087   :  { %828 = vrot.lane.b32.xlu0 %v1467_v40, %s1488_s1 }
0x10f9   :  { %v829_v41 = vpop.permute.xlu0 %828 }
0x10fa   :  { %v831_v42 = vmul.f32 %v1465_v34, %v829_v41 }
0x10fc   :  { %v832_v43 = vmax.f32 %v730_v26, %v831_v42  ;;  %834 = vrot.lane.b32.xlu1 %v831_v42, %s1489_s18 }
0x116e   :  { %v835_v44 = vpop.permute.xlu1 %834 }
0x116f   :  { %1334 = vmatmul.mubr.msk.f32.vlgmr.msra.gmra.mrb[8].mxu1 %vm223_vm5, %v835_v44 }
0x1170   :  { %1355 = vmatprep.mubr.msk.f32.mxu1 %vm1486_vm0, %v1487_v19  ;;  %1420 = vmatpush3.bf16.msra.mxu1 %v1419_v20 }
0x1171   :  { %1421 = vmatprep.subr.bf16.mxu1 %v1485_v4 }
0x1174   :  { %1423 = vmatpush3.bf16.msra.mxu1 %v1422_v23 }
0x1242   :  { %v904_v45 = vpop.f32.mrb[8].mxu1 }
0x1243   :  { %v908_v22 = vadd.f32 %v904_v45, %v1673_v48  ;;  %v1335_v46 = vpop.f32.mrb[9].mxu1 }
0x1245   :  { %v1166_v49 = vmul.f32 -1.442695, %v908_v22 }
0x1247   :  { %1468 = vpow2.f32 %v1166_v49 }
0x1251   :  { %v1469_v50 = vpop.eup %1468 }
0x1252   :  { %v912_v51 = vadd.f32 1.0, %v1469_v50 }
0x1254   :  { %1470 = vrcp.f32 %v912_v51 }
0x125e   :  { %v1471_v52 = vpop.eup %1470 }
0x125f   :  { %v915_v53 = vmul.f32 2.0, %v1471_v52  ;;  %v917_v57 = vmul.f32 %v1471_v52, %v825_v39 }
0x1261   :  { %v1167_v54 = vadd.f32 -1.0, %v915_v53 }
0x1263   :  { %919 = vrot.lane.b32.xlu0 %v1167_v54, %s1488_s1 }
0x12d5   :  { %v920_v55 = vpop.permute.xlu0 %919 }
0x12d6   :  { %v922_v56 = vmul.f32 %v1471_v52, %v920_v55 }
0x12d8   :  { %924 = vrot.lane.b32.xlu1 %v922_v56, %s1489_s18 }
0x134a   :  { %v925_v19 = vpop.permute.xlu1 %924 }
0x134b   :  { %v927_v58 = vadd.f32 %v925_v19, %v917_v57 }
0x134d   :  { %1472 = vtanh.f32 %v927_v58 }
0x1357   :  { %v1473_v48 = vpop.eup %1472 }
0x1358   :  { %930 = vrot.lane.b32.xlu0 %v1473_v48, %s1488_s1 }
0x13ca   :  { %v931_v59 = vpop.permute.xlu0 %930 }
0x13cb   :  { %v933_v60 = vmul.f32 %v1471_v52, %v931_v59 }
0x13cd   :  { %v934_v61 = vmax.f32 %v832_v43, %v933_v60  ;;  %936 = vrot.lane.b32.xlu1 %v933_v60, %s1489_s18 }
0x143f   :  { %v937_v62 = vpop.permute.xlu1 %936 }
0x1440   :  { %1345 = vmatmul.mubr.msk.f32.vlgmr.msra.gmra.mrb[12].mxu0 %vm223_vm5, %v937_v62 }
0x1513   :  { %v1006_v63 = vpop.f32.mrb[12].mxu0 }
0x1514   :  { %v1010_v0 = vadd.f32 %v1671_v47, %v1006_v63  ;;  %v1346_v1 = vpop.f32.mrb[13].mxu0 }
0x1516   :  { %v1169_v2 = vmul.f32 -1.442695, %v1010_v0 }
0x1518   :  { %1474 = vpow2.f32 %v1169_v2 }
0x1522   :  { %v1475_v3 = vpop.eup %1474 }
0x1523   :  { %v1014_v5 = vadd.f32 1.0, %v1475_v3 }
0x1525   :  { %1476 = vrcp.f32 %v1014_v5 }
0x152f   :  { %v1477_v6 = vpop.eup %1476 }
0x1530   :  { %v1017_v7 = vmul.f32 2.0, %v1477_v6  ;;  %v1019_v11 = vmul.f32 %v1477_v6, %v927_v58 }
0x1532   :  { %v1170_v8 = vadd.f32 -1.0, %v1017_v7 }
0x1534   :  { %1021 = vrot.lane.b32.xlu0 %v1170_v8, %s1488_s1 }
0x15a6   :  { %v1022_v9 = vpop.permute.xlu0 %1021 }
0x15a7   :  { %v1024_v10 = vmul.f32 %v1477_v6, %v1022_v9 }
0x15a9   :  { %1026 = vrot.lane.b32.xlu1 %v1024_v10, %s1489_s18 }
0x161b   :  { %v1027_v12 = vpop.permute.xlu1 %1026 }
0x161c   :  { %v1029_v14 = vadd.f32 %v1027_v12, %v1019_v11 }
0x161e   :  { %1478 = vtanh.f32 %v1029_v14 }
0x1628   :  { %v1479_v47 = vpop.eup %1478 }
0x1629   :  { %1032 = vrot.lane.b32.xlu0 %v1479_v47, %s1488_s1 }
0x169b   :  { %v1033_v24 = vpop.permute.xlu0 %1032 }
0x169c   :  { %v1035_v25 = vmul.f32 %v1477_v6, %v1033_v24 }
0x169e   :  { %v1036_v26 = vmax.f32 %v934_v61, %v1035_v25 }
0x16a0   :  { %1480 = vtanh.f32 %v1036_v26 }
0x16aa   :  { %v1481_v27 = vpop.eup %1480 }
0x16ab   :  { %1482 = vtanh.f32 %v1481_v27 }
0x16b5   :  { %v1483_v28 = vpop.eup %1482 }
0x16b6   :  { %1051 = vrot.lane.b32.xlu1 %v1483_v28, %s1489_s18 }
0x1728   :  { %v1052_v29 = vpop.permute.xlu1 %1051 }
0x1729   :  { %1356 = vmatmul.mubr.msk.f32.vlgmr.msra.gmra.mrb[10].mxu1 %vm223_vm5, %v1052_v29 }
0x17fc   :  { %v1121_v31 = vpop.f32.mrb[10].mxu1 }
0x17fd   :  { %v1122_v4 = vadd.f32 %v1171_v30, %v1121_v31  ;;  %v1357_v32 = vpop.f32.mrb[11].mxu1 }
0x17ff   :  { %1126 = vst.msk [vmem:[%s1742_s5] sm:$0xff] %vm1125_vm12, %v1122_v4 }

</bundles_post_ra>
